<compile_context>
chip_gen: v6e
topology: v6e:2x2x1
jax: 0.10.0
libtpu: 0.0.40
codegen_flags: <defaults>
</compile_context>

<pallas_src>
import jax
import jax.numpy as jnp
from jax.experimental import pallas as pl
from jax.experimental.pallas import tpu as pltpu

EPS = 1e-5


def _round_up(n, m):
    return ((n + m - 1) // m) * m


def _bf16_epilogue_default():
    # v6e/v7x have a native-bf16 VPU; v5e and older do not (bf16 elementwise
    # would be emulated), so keep the f32 epilogue there.
    try:
        kind = jax.devices()[0].device_kind.lower()
    except Exception:
        return True
    return not any(t in kind for t in ("v2", "v3", "v4", "v5"))


# ---------------------------------------------------------------------------
# Kernel: 4 matmuls + bias/ReLU epilogues + sigmoid, all weights VMEM-resident.
# ---------------------------------------------------------------------------
def mlp_kernel(x_ref, w1, b1, w2, b2, w3, b3, w4, b4, o_ref):
    # Eval-mode: BatchNorm folded into (w, b) on host; Dropout is identity.
    x = x_ref[...].astype(jnp.bfloat16)                     # in-kernel cast, no host pass

    def layer(h_in, w_ref, b_ref):
        acc = jnp.dot(h_in, w_ref[...], preferred_element_type=jnp.float32)
        bias = b_ref[...]                                   # epilogue dtype (bf16 on v6e/v7x)
        h = jnp.maximum(acc.astype(bias.dtype) + bias, 0.0)
        return h.astype(jnp.bfloat16)                       # bf16 MXU operand for next dot

    h = layer(x, w1, b1)
    h = layer(h, w2, b2)
    h = layer(h, w3, b3)

    logits = jnp.dot(h, w4[...], preferred_element_type=jnp.float32) + b4[...]
    o_ref[...] = jax.nn.sigmoid(logits).astype(o_ref.dtype)  # EUP; bf16 store


# ---------------------------------------------------------------------------
# One-time parameter preparation (hoisted out of the forward pass).
# ---------------------------------------------------------------------------
def prepare_params(params, *, bf16_epilogue=None):
    """Fold eval-mode BatchNorm into the preceding Linear (exact:
    W' = W * gamma*rsqrt(rv+eps), b' = (b-rm)*scale + beta), cast MXU operands
    to bf16 and zero-pad the final layer to a lane-dense multiple of 128.
    Call once and reuse the result across forward passes."""
    if bf16_epilogue is None:
        bf16_epilogue = _bf16_epilogue_default()
    epi = jnp.bfloat16 if bf16_epilogue else jnp.float32

    (w1, b1, g1, be1, rm1, rv1,
     w2, b2, g2, be2, rm2, rv2,
     w3, b3, g3, be3, rm3, rv3,
     w4, b4) = params

    def fold(w, b, g, be, rm, rv):
        s = g * jax.lax.rsqrt(rv + EPS)                      # [1, out]
        wf = (w * s).astype(jnp.bfloat16)                    # bf16 MXU operand
        bf = ((b - rm) * s + be).astype(epi)                 # epilogue dtype
        return wf, bf

    w1f, b1f = fold(w1, b1, g1, be1, rm1, rv1)
    w2f, b2f = fold(w2, b2, g2, be2, rm2, rv2)
    w3f, b3f = fold(w3, b3, g3, be3, rm3, rv3)

    n_out = int(w4.shape[1])
    n_pad = _round_up(max(n_out, 128), 128)                  # lane-dense output
    w4p = jnp.zeros((w4.shape[0], n_pad), jnp.bfloat16).at[:, :n_out].set(
        w4.astype(jnp.bfloat16))
    b4p = jnp.zeros((1, n_pad), jnp.float32).at[:, :n_out].set(
        b4.astype(jnp.float32))

    weights = (w1f, b1f, w2f, b2f, w3f, b3f, w4p, b4p)
    return weights, n_out


# ---------------------------------------------------------------------------
# Forward wrapper.
# ---------------------------------------------------------------------------
def minesweeper_net(x, prepared, *, batch_tile=1024):
    """x: [B, 2*input_size] float32. prepared: output of prepare_params()."""
    weights, n_out = prepared
    n_pad = weights[6].shape[1]
    B, d_in = x.shape

    # Batch tiling: single block for small B (latency path); otherwise split
    # into >= 2 tiles (keeps both v7x TensorCores busy), capped at batch_tile
    # rows and rounded to a multiple of 16.  Ragged last block handled by Pallas.
    if B <= 256:
        tb = B
    else:
        tb = min(batch_tile, _round_up(pl.cdiv(B, 2), 16))
    grid = (pl.cdiv(B, tb),)

    in_specs = [pl.BlockSpec((tb, d_in), lambda i: (i, 0))]                 # x: per-tile
    in_specs += [pl.BlockSpec(w.shape, lambda i: (0, 0)) for w in weights]  # VMEM-resident
    out_spec = pl.BlockSpec((tb, n_pad), lambda i: (i, 0))

    out = pl.pallas_call(
        mlp_kernel,
        out_shape=jax.ShapeDtypeStruct((B, n_pad), jnp.bfloat16),
        grid_spec=pltpu.PrefetchScalarGridSpec(
            num_scalar_prefetch=0,
            grid=grid,
            in_specs=in_specs,
            out_specs=out_spec,
        ),
        compiler_params=pltpu.CompilerParams(
            dimension_semantics=("parallel",),      # v7x: shard batch tiles over 2 TCs
            vmem_limit_bytes=32 * 1024 * 1024,      # safe on every generation
        ),
    )(x, *weights)

    # Slice the padded lane-dense output back to input_size; f32 like PyTorch.
    return out[:, :n_out].astype(jnp.float32)


# ---------------------------------------------------------------------------
# PyTorch-equivalent init + pure-JAX reference (for correctness checking).
# ---------------------------------------------------------------------------
def init_params(key, input_size):
    """PyTorch-default-like init (Linear: U(-1/sqrt(fan_in), +); BN: gamma=1,
    beta=0, running_mean=0, running_var=1)."""
    dims = [2 * input_size, 512, 256, 128, input_size]
    params = []
    keys = jax.random.split(key, 8)
    ki = 0
    for li, (din, dout) in enumerate(zip(dims[:-1], dims[1:])):
        bound = 1.0 / (din ** 0.5)
        w = jax.random.uniform(keys[ki], (din, dout), jnp.float32, -bound, bound)
        b = jax.random.uniform(keys[ki + 1], (1, dout), jnp.float32, -bound, bound)
        ki += 2
        params.extend([w, b])
        if li < 3:  # first three Linear layers are followed by BatchNorm1d
            params.extend([
                jnp.ones((1, dout), jnp.float32),    # gamma
                jnp.zeros((1, dout), jnp.float32),   # beta
                jnp.zeros((1, dout), jnp.float32),   # running_mean
                jnp.ones((1, dout), jnp.float32),    # running_var
            ])
    return tuple(params)


def reference_forward(x, params):
    (w1, b1, g1, be1, rm1, rv1,
     w2, b2, g2, be2, rm2, rv2,
     w3, b3, g3, be3, rm3, rv3,
     w4, b4) = params

    def bn(h, g, be, rm, rv):
        return (h - rm) / jnp.sqrt(rv + EPS) * g + be

    h = jnp.maximum(bn(x @ w1 + b1, g1, be1, rm1, rv1), 0.0)
    h = jnp.maximum(bn(h @ w2 + b2, g2, be2, rm2, rv2), 0.0)
    h = jnp.maximum(bn(h @ w3 + b3, g3, be3, rm3, rv3), 0.0)
    return jax.nn.sigmoid(h @ w4 + b4)


if __name__ == "__main__":
    input_size = 64   # e.g. 8x8 minesweeper board -> d_in = 128
    key = jax.random.PRNGKey(0)
    k_x, k_p, k_x2 = jax.random.split(key, 3)

    params = init_params(k_p, input_size)
    prepared = prepare_params(params)                    # one-time weight prep (hoisted)
    fwd = jax.jit(lambda x: minesweeper_net(x, prepared))

    # Small batch: single grid block.
    batch = 8
    x = jax.random.normal(k_x, (batch, 2 * input_size), dtype=jnp.float32)
    out = jax.block_until_ready(fwd(x))
    ref = reference_forward(x, params)
    assert out.shape == (batch, input_size)
    # bf16 MXU operands / bf16 epilogue+output (f32 accumulate) => relaxed tolerance.
    assert jnp.allclose(out, ref, rtol=4e-2, atol=4e-2), "mismatch (small batch)"

    # Larger batch exercising multi-tile grid + ragged last block (600 -> 2 tiles of 304).
    batch2 = 600
    x2 = jax.random.normal(k_x2, (batch2, 2 * input_size), dtype=jnp.float32)
    out2 = jax.block_until_ready(fwd(x2))
    ref2 = reference_forward(x2, params)
    assert out2.shape == (batch2, input_size)
    assert jnp.allclose(out2, ref2, rtol=4e-2, atol=4e-2), "mismatch (tiled batch)"

    print("KERNEL_OK")
</pallas_src>

<mosaic_0001>
module attributes {stable_mosaic.version = 11 : i64} {
  func.func @mlp_kernel(%arg0: i32, %arg1: memref<8x128xf32, #tpu.memory_space<vmem>>, %arg2: memref<128x512xbf16, #tpu.memory_space<vmem>>, %arg3: memref<1x512xbf16, #tpu.memory_space<vmem>>, %arg4: memref<512x256xbf16, #tpu.memory_space<vmem>>, %arg5: memref<1x256xbf16, #tpu.memory_space<vmem>>, %arg6: memref<256x128xbf16, #tpu.memory_space<vmem>>, %arg7: memref<1x128xbf16, #tpu.memory_space<vmem>>, %arg8: memref<128x128xbf16, #tpu.memory_space<vmem>>, %arg9: memref<1x128xf32, #tpu.memory_space<vmem>>, %arg10: memref<8x128xbf16, #tpu.memory_space<vmem>>) attributes {dimension_semantics = [#tpu.dimension_semantics<parallel>], iteration_bounds = array<i64: 1>, scalar_prefetch = 0 : i64, scratch_operands = 0 : i64, tpu.core_type = #tpu.core_type<tc>, window_params = [{transform_indices = @transform_0, window_bounds = array<i64: 8, 128>}, {pipeline_mode = #tpu.pipeline_mode<synchronous>, transform_indices = @transform_1, window_bounds = array<i64: 128, 512>}, {pipeline_mode = #tpu.pipeline_mode<synchronous>, transform_indices = @transform_2, window_bounds = array<i64: 1, 512>}, {pipeline_mode = #tpu.pipeline_mode<synchronous>, transform_indices = @transform_3, window_bounds = array<i64: 512, 256>}, {pipeline_mode = #tpu.pipeline_mode<synchronous>, transform_indices = @transform_4, window_bounds = array<i64: 1, 256>}, {pipeline_mode = #tpu.pipeline_mode<synchronous>, transform_indices = @transform_5, window_bounds = array<i64: 256, 128>}, {pipeline_mode = #tpu.pipeline_mode<synchronous>, transform_indices = @transform_6, window_bounds = array<i64: 1, 128>}, {pipeline_mode = #tpu.pipeline_mode<synchronous>, transform_indices = @transform_7, window_bounds = array<i64: 128, 128>}, {pipeline_mode = #tpu.pipeline_mode<synchronous>, transform_indices = @transform_8, window_bounds = array<i64: 1, 128>}, {transform_indices = @transform_9, window_bounds = array<i64: 8, 128>}]} {
    %c0 = arith.constant 0 : index
    %c0_0 = arith.constant 0 : index
    %0 = vector.load %arg1[%c0, %c0_0] : memref<8x128xf32, #tpu.memory_space<vmem>>, vector<8x128xf32>
    %1 = arith.truncf %0 : vector<8x128xf32> to vector<8x128xbf16>
    %c0_1 = arith.constant 0 : index
    %c0_2 = arith.constant 0 : index
    %2 = vector.load %arg2[%c0_1, %c0_2] : memref<128x512xbf16, #tpu.memory_space<vmem>>, vector<128x512xbf16>
    %cst = arith.constant dense<0.000000e+00> : vector<8x512xf32>
    %3 = tpu.matmul %1, %2, %cst {dimension_numbers = #tpu.dot_dimension_numbers<[1], [0], [0], [1], [0, 0, 1, 1], [], []>} : vector<8x128xbf16>, vector<128x512xbf16>, vector<8x512xf32> -> vector<8x512xf32>
    %c0_3 = arith.constant 0 : index
    %c0_4 = arith.constant 0 : index
    %4 = vector.load %arg3[%c0_3, %c0_4] : memref<1x512xbf16, #tpu.memory_space<vmem>>, vector<1x512xbf16>
    %5 = arith.truncf %3 : vector<8x512xf32> to vector<8x512xbf16>
    %6 = vector.broadcast %4 : vector<1x512xbf16> to vector<8x512xbf16>
    %7 = arith.addf %5, %6 : vector<8x512xbf16>
    %cst_5 = arith.constant 0.000000e+00 : bf16
    %8 = vector.broadcast %cst_5 : bf16 to vector<8x512xbf16>
    %9 = arith.maximumf %7, %8 : vector<8x512xbf16>
    %c0_6 = arith.constant 0 : index
    %c0_7 = arith.constant 0 : index
    %10 = vector.load %arg4[%c0_6, %c0_7] : memref<512x256xbf16, #tpu.memory_space<vmem>>, vector<512x256xbf16>
    %cst_8 = arith.constant dense<0.000000e+00> : vector<8x256xf32>
    %11 = tpu.matmul %9, %10, %cst_8 {dimension_numbers = #tpu.dot_dimension_numbers<[1], [0], [0], [1], [0, 0, 1, 1], [], []>} : vector<8x512xbf16>, vector<512x256xbf16>, vector<8x256xf32> -> vector<8x256xf32>
    %c0_9 = arith.constant 0 : index
    %c0_10 = arith.constant 0 : index
    %12 = vector.load %arg5[%c0_9, %c0_10] : memref<1x256xbf16, #tpu.memory_space<vmem>>, vector<1x256xbf16>
    %13 = arith.truncf %11 : vector<8x256xf32> to vector<8x256xbf16>
    %14 = vector.broadcast %12 : vector<1x256xbf16> to vector<8x256xbf16>
    %15 = arith.addf %13, %14 : vector<8x256xbf16>
    %cst_11 = arith.constant 0.000000e+00 : bf16
    %16 = vector.broadcast %cst_11 : bf16 to vector<8x256xbf16>
    %17 = arith.maximumf %15, %16 : vector<8x256xbf16>
    %c0_12 = arith.constant 0 : index
    %c0_13 = arith.constant 0 : index
    %18 = vector.load %arg6[%c0_12, %c0_13] : memref<256x128xbf16, #tpu.memory_space<vmem>>, vector<256x128xbf16>
    %cst_14 = arith.constant dense<0.000000e+00> : vector<8x128xf32>
    %19 = tpu.matmul %17, %18, %cst_14 {dimension_numbers = #tpu.dot_dimension_numbers<[1], [0], [0], [1], [0, 0, 1, 1], [], []>} : vector<8x256xbf16>, vector<256x128xbf16>, vector<8x128xf32> -> vector<8x128xf32>
    %c0_15 = arith.constant 0 : index
    %c0_16 = arith.constant 0 : index
    %20 = vector.load %arg7[%c0_15, %c0_16] : memref<1x128xbf16, #tpu.memory_space<vmem>>, vector<1x128xbf16>
    %21 = arith.truncf %19 : vector<8x128xf32> to vector<8x128xbf16>
    %22 = vector.broadcast %20 : vector<1x128xbf16> to vector<8x128xbf16>
    %23 = arith.addf %21, %22 : vector<8x128xbf16>
    %cst_17 = arith.constant 0.000000e+00 : bf16
    %24 = vector.broadcast %cst_17 : bf16 to vector<8x128xbf16>
    %25 = arith.maximumf %23, %24 : vector<8x128xbf16>
    %c0_18 = arith.constant 0 : index
    %c0_19 = arith.constant 0 : index
    %26 = vector.load %arg8[%c0_18, %c0_19] : memref<128x128xbf16, #tpu.memory_space<vmem>>, vector<128x128xbf16>
    %cst_20 = arith.constant dense<0.000000e+00> : vector<8x128xf32>
    %27 = tpu.matmul %25, %26, %cst_20 {dimension_numbers = #tpu.dot_dimension_numbers<[1], [0], [0], [1], [0, 0, 1, 1], [], []>} : vector<8x128xbf16>, vector<128x128xbf16>, vector<8x128xf32> -> vector<8x128xf32>
    %c0_21 = arith.constant 0 : index
    %c0_22 = arith.constant 0 : index
    %28 = vector.load %arg9[%c0_21, %c0_22] : memref<1x128xf32, #tpu.memory_space<vmem>>, vector<1x128xf32>
    %29 = vector.broadcast %28 : vector<1x128xf32> to vector<8x128xf32>
    %30 = arith.addf %27, %29 : vector<8x128xf32>
    %31 = arith.negf %30 : vector<8x128xf32>
    %32 = math.exp %31 : vector<8x128xf32>
    %cst_23 = arith.constant 1.000000e+00 : f32
    %33 = vector.broadcast %cst_23 : f32 to vector<8x128xf32>
    %34 = arith.addf %33, %32 : vector<8x128xf32>
    %35 = arith.divf %33, %34 : vector<8x128xf32>
    %36 = arith.truncf %35 : vector<8x128xf32> to vector<8x128xbf16>
    %c0_24 = arith.constant 0 : index
    %c0_25 = arith.constant 0 : index
    %37 = vector.load %arg10[%c0_24, %c0_25] : memref<8x128xbf16, #tpu.memory_space<vmem>>, vector<8x128xbf16>
    tpu.vector_store %arg10[%c0_24, %c0_25], %36 {strides = array<i32>} : memref<8x128xbf16, #tpu.memory_space<vmem>>, vector<8x128xbf16>,
    return
  }
  func.func @transform_0(%arg0: i32) -> (i32, i32) {
    %c0_i32 = arith.constant 0 : i32
    %c0_i32_0 = arith.constant 0 : i32
    return %arg0, %c0_i32 : i32, i32
  }
  func.func @transform_1(%arg0: i32) -> (i32, i32) {
    %c0_i32 = arith.constant 0 : i32
    %c0_i32_0 = arith.constant 0 : i32
    %c0_i32_1 = arith.constant 0 : i32
    return %c0_i32, %c0_i32_0 : i32, i32
  }
  func.func @transform_2(%arg0: i32) -> (i32, i32) {
    %c0_i32 = arith.constant 0 : i32
    %c0_i32_0 = arith.constant 0 : i32
    %c0_i32_1 = arith.constant 0 : i32
    return %c0_i32, %c0_i32_0 : i32, i32
  }
  func.func @transform_3(%arg0: i32) -> (i32, i32) {
    %c0_i32 = arith.constant 0 : i32
    %c0_i32_0 = arith.constant 0 : i32
    %c0_i32_1 = arith.constant 0 : i32
    return %c0_i32, %c0_i32_0 : i32, i32
  }
  func.func @transform_4(%arg0: i32) -> (i32, i32) {
    %c0_i32 = arith.constant 0 : i32
    %c0_i32_0 = arith.constant 0 : i32
    %c0_i32_1 = arith.constant 0 : i32
    return %c0_i32, %c0_i32_0 : i32, i32
  }
  func.func @transform_5(%arg0: i32) -> (i32, i32) {
    %c0_i32 = arith.constant 0 : i32
    %c0_i32_0 = arith.constant 0 : i32
    %c0_i32_1 = arith.constant 0 : i32
    return %c0_i32, %c0_i32_0 : i32, i32
  }
  func.func @transform_6(%arg0: i32) -> (i32, i32) {
    %c0_i32 = arith.constant 0 : i32
    %c0_i32_0 = arith.constant 0 : i32
    %c0_i32_1 = arith.constant 0 : i32
    return %c0_i32, %c0_i32_0 : i32, i32
  }
  func.func @transform_7(%arg0: i32) -> (i32, i32) {
    %c0_i32 = arith.constant 0 : i32
    %c0_i32_0 = arith.constant 0 : i32
    %c0_i32_1 = arith.constant 0 : i32
    return %c0_i32, %c0_i32_0 : i32, i32
  }
  func.func @transform_8(%arg0: i32) -> (i32, i32) {
    %c0_i32 = arith.constant 0 : i32
    %c0_i32_0 = arith.constant 0 : i32
    %c0_i32_1 = arith.constant 0 : i32
    return %c0_i32, %c0_i32_0 : i32, i32
  }
  func.func @transform_9(%arg0: i32) -> (i32, i32) {
    %c0_i32 = arith.constant 0 : i32
    %c0_i32_0 = arith.constant 0 : i32
    return %arg0, %c0_i32 : i32, i32
  }
}

</mosaic_0001>

<bundles_post_ra>
// kernel: _lambda_.1
= control target key start
LH: loop header
LB: loop body
LE: loop exit
PB: predicated region body
PF: predicated region fallthrough
CT: control target
= control target key end

     0   :  { %14 = vsyncpa [#allocation3], 0  ;;  %s1880_s0 = inlined_call_operand.hbm [shape: f32[8,128], index: 0, kind: input, shape index: {}]   ;;  %s1881_s1 = inlined_call_operand.hbm [shape: bf16[128,512], index: 1, kind: input, shape index: {}]   ;;  %s1882_s2 = inlined_call_operand.hbm [shape: bf16[1,512], index: 2, kind: input, shape index: {}]   ;;  %s1883_s3 = inlined_call_operand.hbm [shape: bf16[512,256], index: 3, kind: input, shape index: {}]   ;;  %s1884_s4 = inlined_call_operand.vmem [shape: bf16[1,256], index: 4, kind: input, shape index: {}]   ;;  %s1885_s5 = inlined_call_operand.hbm [shape: bf16[256,128], index: 5, kind: input, shape index: {}]   ;;  %s1886_s6 = inlined_call_operand.vmem [shape: bf16[1,128], index: 6, kind: input, shape index: {}]   ;;  %s1887_s7 = inlined_call_operand.hbm [shape: bf16[128,128], index: 7, kind: input, shape index: {}]   ;;  %s1888_s8 = inlined_call_operand.vmem [shape: f32[1,128], index: 8, kind: input, shape index: {}]   ;;  %s1889_s9 = inlined_call_operand.vmem [shape: bf16[8,128], index: 9, kind: output, shape index: {}]  }
   0x1   :  { %15 = vsyncpa [#allocation5], 0 }
   0x2   :  { %16 = vsyncpa [#allocation8], 0 }
   0x3   :  { %17 = vsyncpa [#allocation11], 0  ;;  %s1760_s30 = smov [#allocation4]  }
   0x4   :  { %s33_s10 = sshll.u32 %s1760_s30, 4  ;;  %s34_s10 = int_to_ptr.vmem [resolvable:$true] %s33_s10 }
   0x5   :  { %s1640_s11 = scalar_lea.vmem %s34_s10, 4096  ;;  %p1645_p1 = scmp.lt.s32.totalorder %s34_s10, %s34_s10 }
   0x6   :  { %p1641_p0 = scmp.ne.s32.totalorder %s34_s10, %s1640_s11  ;;  %p1646_p2 = scmp.lt.s32.totalorder %s1640_s11, %s1640_s11 }
   0x8   :  { %p1647_p3 = por %p1646_p2, %p1645_p1 }
   0xa   :  { %p1648_p4 = pnand %p1647_p3, %p1641_p0 }
   0xc   :  { %1651 = shalt.err (!%p1648_p4)
}
   0xd   :  { %s1761_s12 = smov 256   ;;  %s1762_s13 = smov 16  }
   0xe   :  { %39 = dma.hbm_to_vmem [thread:$0]  %s1881_s1, 4096, %s34_s10, [#allocation5], %s1761_s12, %s1761_s12, %s1762_s13  }
   0xf   :  { %s1763_s16 = smov [#allocation7]  }
  0x10   :  { %s55_s17 = sshll.u32 %s1763_s16, 4  ;;  %s56_s17 = int_to_ptr.vmem [resolvable:$true] %s55_s17 }
  0x11   :  { %s1660_s18 = scalar_lea.vmem %s56_s17, 8192  ;;  %p1665_p6 = scmp.lt.s32.totalorder %s56_s17, %s56_s17 }
  0x12   :  { %p1661_p5 = scmp.ne.s32.totalorder %s56_s17, %s1660_s18  ;;  %p1666_p7 = scmp.lt.s32.totalorder %s1660_s18, %s1660_s18 }
  0x14   :  { %p1667_p8 = por %p1666_p7, %p1665_p6 }
  0x16   :  { %p1668_p9 = pnand %p1667_p8, %p1661_p5 }
  0x18   :  { %1671 = shalt.err (!%p1668_p9)
}
  0x19   :  { %s1764_s19 = smov 128   ;;  %s1765_s20 = smov 8  }
  0x1a   :  { %61 = dma.hbm_to_vmem [thread:$0]  %s1883_s3, 8192, %s56_s17, [#allocation8], %s1764_s19, %s1764_s19, %s1765_s20  }
  0x1b   :  { %s1766_s23 = smov [#allocation2]   ;;  %s1767_s25 = smov [#allocation6]  }
  0x1c   :  { %s24_s24 = sshll.u32 %s1766_s23, 4  ;;  %s46_s1 = sshll.u32 %s1767_s25, 4  ;;  %s25_s24 = int_to_ptr.vmem [resolvable:$true] %s24_s24  ;;  %s47_s1 = int_to_ptr.vmem [resolvable:$true] %s46_s1 }
  0x1d   :  { %s1680_s26 = scalar_lea.vmem %s25_s24, 128  ;;  %p1685_p11 = scmp.lt.s32.totalorder %s25_s24, %s25_s24 }
  0x1e   :  { %p1681_p10 = scmp.ne.s32.totalorder %s25_s24, %s1680_s26  ;;  %p1686_p12 = scmp.lt.s32.totalorder %s1680_s26, %s1680_s26 }
  0x20   :  { %p1687_p13 = por %p1686_p12, %p1685_p11 }
  0x22   :  { %p1688_p0 = pnand %p1687_p13, %p1681_p10 }
  0x24   :  { %1691 = shalt.err (!%p1688_p0)
}
  0x25   :  { %27 = dma.hbm_to_vmem [thread:$0]  %s1880_s0, 128, %s25_s24, [#allocation3]  }
  0x26   :  { %s1700_s29 = scalar_lea.vmem %s47_s1, 64  ;;  %p1705_p2 = scmp.lt.s32.totalorder %s47_s1, %s47_s1 }
  0x27   :  { %p1701_p1 = scmp.ne.s32.totalorder %s47_s1, %s1700_s29  ;;  %p1706_p3 = scmp.lt.s32.totalorder %s1700_s29, %s1700_s29 }
  0x29   :  { %p1707_p4 = por %p1706_p3, %p1705_p2 }
  0x2b   :  { %p1708_p5 = pnand %p1707_p4, %p1701_p1 }
  0x2d   :  { %1711 = shalt.err (!%p1708_p5)
}
  0x2e   :  { %49 = dma.hbm_to_vmem [thread:$0]  %s1882_s2, 64, %s47_s1, [#allocation5]  }
  0x2f   :  { %s1768_s10 = smov [#allocation9]  }
  0x30   :  { %s69_s11 = sshll.u32 %s1768_s10, 4  ;;  %s70_s11 = int_to_ptr.vmem [resolvable:$true] %s69_s11 }
  0x31   :  { %s1720_s12 = scalar_lea.vmem %s70_s11, 2048  ;;  %p1725_p7 = scmp.lt.s32.totalorder %s70_s11, %s70_s11 }
  0x32   :  { %p1721_p6 = scmp.ne.s32.totalorder %s70_s11, %s1720_s12  ;;  %p1726_p8 = scmp.lt.s32.totalorder %s1720_s12, %s1720_s12 }
  0x34   :  { %p1727_p9 = por %p1726_p8, %p1725_p7 }
  0x36   :  { %p1728_p10 = pnand %p1727_p9, %p1721_p6 }
  0x38   :  { %1731 = shalt.err (!%p1728_p10)
}
  0x39   :  { %s1769_s0 = smov 64   ;;  %s1770_s13 = smov 4  }
  0x3a   :  { %75 = dma.hbm_to_vmem [thread:$0]  %s1885_s5, 2048, %s70_s11, [#allocation8], %s1769_s0, %s1769_s0, %s1770_s13  }
  0x3b   :  { %s1771_s16 = smov [#allocation10]  }
  0x3c   :  { %s83_s17 = sshll.u32 %s1771_s16, 4  ;;  %s84_s17 = int_to_ptr.vmem [resolvable:$true] %s83_s17 }
  0x3d   :  { %s1740_s2 = scalar_lea.vmem %s84_s17, 1024  ;;  %p1745_p12 = scmp.lt.s32.totalorder %s84_s17, %s84_s17 }
  0x3e   :  { %p1741_p11 = scmp.ne.s32.totalorder %s84_s17, %s1740_s2  ;;  %p1746_p13 = scmp.lt.s32.totalorder %s1740_s2, %s1740_s2 }
  0x40   :  { %p1747_p0 = por %p1746_p13, %p1745_p12 }
  0x42   :  { %p1748_p1 = pnand %p1747_p0, %p1741_p11 }
  0x44   :  { %1751 = shalt.err (!%p1748_p1)
}
  0x45   :  { %89 = dma.hbm_to_vmem [thread:$0]  %s1887_s7, 1024, %s84_s17, [#allocation11], %s1769_s0, %s1769_s0, %s1770_s13  }
  0x46   :  { %1752 = dma.done.wait [#allocation3], 128  }
  0x47   :  { %1753 = vsyncadd [#allocation3], 4294967168 }
  0x48   :  { %1754 = dma.done.wait [#allocation5], 4160  }
  0x49   :  { %1755 = vsyncadd [#allocation5], 4294963136 }
  0x4a   :  { %1756 = dma.done.wait [#allocation8], 10240  }
  0x4b   :  { %1757 = vsyncadd [#allocation8], 4294957056 }
  0x4c   :  { %1758 = dma.done.wait [#allocation11], 1024  }
  0x4d   :  { %1759 = vsyncadd [#allocation11], 4294966272  ;;  %v1772_v0 = vmov 0   ;;  %v1460_v1 = vld [vmem:[#allocation4 + $0xe4] ss:$16 sps:$4 sm:$0xff]   ;;  %v111_v33 = vld [vmem:[#allocation2] sm:$0xff] }
  0x4e   :  { %337 = vmatprep.mubr.bf16.mxu0 %v1772_v0  ;;  %378 = vmatprep.mubr.bf16.mxu1 %v1772_v0  ;;  %v1462_v2 = vld [vmem:[#allocation4 + $0xec] ss:$16 sps:$4 sm:$0xff]   ;;  %v1464_v3 = vld [vmem:[#allocation4 + $0xe0] ss:$16 sps:$4 sm:$0xff]   ;;  %v1465_v4 = vld [vmem:[#allocation4 + $0xe8] ss:$16 sps:$4 sm:$0xff]   ;;  %v112_v36 = vpack.c.bf16 %v111_v33, %v111_v33 }
  0x4f   :  { %305 = vmatprep.subr.bf16.mxu0 %v1460_v1  ;;  %346 = vmatprep.subr.bf16.mxu1 %v1462_v2  ;;  %v1466_v5 = vld [vmem:[#allocation4 + $0xc4] ss:$16 sps:$4 sm:$0xff]   ;;  %v1468_v6 = vld [vmem:[#allocation4 + $0xcc] ss:$16 sps:$4 sm:$0xff]   ;;  %v1470_v7 = vld [vmem:[#allocation4 + $0xc0] ss:$16 sps:$4 sm:$0xff]  }
  0x50   :  { %306 = vmatpush1.bf16.msra.mxu0 %v1464_v3  ;;  %347 = vmatpush1.bf16.msra.mxu1 %v1465_v4  ;;  %v1471_v8 = vld [vmem:[#allocation4 + $0xc8] ss:$16 sps:$4 sm:$0xff]   ;;  %v1472_v9 = vld [vmem:[#allocation4 + $0xa4] ss:$16 sps:$4 sm:$0xff]   ;;  %v1474_v10 = vld [vmem:[#allocation4 + $0xac] ss:$16 sps:$4 sm:$0xff]  }
  0x51   :  { %307 = vmatprep.subr.bf16.mxu0 %v1466_v5  ;;  %348 = vmatprep.subr.bf16.mxu1 %v1468_v6  ;;  %v1476_v11 = vld [vmem:[#allocation4 + $0xa0] ss:$16 sps:$4 sm:$0xff]   ;;  %v1477_v12 = vld [vmem:[#allocation4 + $0xa8] ss:$16 sps:$4 sm:$0xff]   ;;  %v1478_v13 = vld [vmem:[#allocation4 + $0x84] ss:$16 sps:$4 sm:$0xff]  }
  0x52   :  { %v1480_v14 = vld [vmem:[#allocation4 + $0x8c] ss:$16 sps:$4 sm:$0xff]   ;;  %v1482_v15 = vld [vmem:[#allocation4 + $0x80] ss:$16 sps:$4 sm:$0xff]   ;;  %v1483_v16 = vld [vmem:[#allocation4 + $0x88] ss:$16 sps:$4 sm:$0xff]  }
  0x53   :  { %v1484_v17 = vld [vmem:[#allocation4 + $0x64] ss:$16 sps:$4 sm:$0xff]   ;;  %v1486_v18 = vld [vmem:[#allocation4 + $0x6c] ss:$16 sps:$4 sm:$0xff]   ;;  %v1488_v19 = vld [vmem:[#allocation4 + $0x60] ss:$16 sps:$4 sm:$0xff]  }
  0x54   :  { %308 = vmatpush1.bf16.msra.mxu0 %v1470_v7  ;;  %349 = vmatpush1.bf16.msra.mxu1 %v1471_v8  ;;  %v1489_v20 = vld [vmem:[#allocation4 + $0x68] ss:$16 sps:$4 sm:$0xff]   ;;  %v1490_v21 = vld [vmem:[#allocation4 + $0x44] ss:$16 sps:$4 sm:$0xff]   ;;  %v1492_v22 = vld [vmem:[#allocation4 + $0x4c] ss:$16 sps:$4 sm:$0xff]  }
  0x55   :  { %309 = vmatprep.subr.bf16.mxu0 %v1472_v9  ;;  %350 = vmatprep.subr.bf16.mxu1 %v1474_v10  ;;  %v1494_v23 = vld [vmem:[#allocation4 + $0x40] ss:$16 sps:$4 sm:$0xff]   ;;  %v1495_v24 = vld [vmem:[#allocation4 + $0x48] ss:$16 sps:$4 sm:$0xff]   ;;  %v1496_v25 = vld [vmem:[#allocation4 + $0x24] ss:$16 sps:$4 sm:$0xff]  }
  0x56   :  { %v1498_v26 = vld [vmem:[#allocation4 + $0x2c] ss:$16 sps:$4 sm:$0xff]   ;;  %v1500_v27 = vld [vmem:[#allocation4 + $0x20] ss:$16 sps:$4 sm:$0xff]   ;;  %v1501_v28 = vld [vmem:[#allocation4 + $0x28] ss:$16 sps:$4 sm:$0xff]  }
  0x57   :  { %v1502_v29 = vld [vmem:[#allocation4 + $0x4] ss:$16 sps:$4 sm:$0xff]   ;;  %v1504_v30 = vld [vmem:[#allocation4 + $0xc] ss:$16 sps:$4 sm:$0xff]   ;;  %v1506_v31 = vld [vmem:[#allocation4] ss:$16 sps:$4 sm:$0xff]  }
  0x58   :  { %310 = vmatpush1.bf16.msra.mxu0 %v1476_v11  ;;  %351 = vmatpush1.bf16.msra.mxu1 %v1477_v12  ;;  %v1507_v32 = vld [vmem:[#allocation4 + $0x8] ss:$16 sps:$4 sm:$0xff]   ;;  %v1508_v37 = vld [vmem:[#allocation7 + $0x70] ss:$8 sps:$4 sm:$0xff]   ;;  %v1514_v41 = vld [vmem:[#allocation7 + $0x60] ss:$8 sps:$4 sm:$0xff]  }
  0x59   :  { %311 = vmatprep.subr.bf16.mxu0 %v1478_v13  ;;  %352 = vmatprep.subr.bf16.mxu1 %v1480_v14  ;;  %v1510_v34 = vld [vmem:[#allocation7 + $0x74] ss:$8 sps:$4 sm:$0xff]   ;;  %v1511_v38 = vld [vmem:[#allocation7 + $0x170] ss:$8 sps:$4 sm:$0xff]   ;;  %v1516_v39 = vld [vmem:[#allocation7 + $0x64] ss:$8 sps:$4 sm:$0xff]  }
  0x5a   :  { %v1513_v35 = vld [vmem:[#allocation7 + $0x174] ss:$8 sps:$4 sm:$0xff]   ;;  %v1519_v40 = vld [vmem:[#allocation7 + $0x164] ss:$8 sps:$4 sm:$0xff]   ;;  %v1517_v42 = vld [vmem:[#allocation7 + $0x160] ss:$8 sps:$4 sm:$0xff]  }
  0x5b   :  { %v1522_v43 = vld [vmem:[#allocation7 + $0x54] ss:$8 sps:$4 sm:$0xff]   ;;  %v1520_v45 = vld [vmem:[#allocation7 + $0x50] ss:$8 sps:$4 sm:$0xff]   ;;  %v1528_v47 = vld [vmem:[#allocation7 + $0x44] ss:$8 sps:$4 sm:$0xff]  }
  0x5c   :  { %312 = vmatpush1.bf16.msra.mxu0 %v1482_v15  ;;  %353 = vmatpush1.bf16.msra.mxu1 %v1483_v16  ;;  %v1525_v44 = vld [vmem:[#allocation7 + $0x154] ss:$8 sps:$4 sm:$0xff]   ;;  %v1523_v46 = vld [vmem:[#allocation7 + $0x150] ss:$8 sps:$4 sm:$0xff]   ;;  %v1531_v48 = vld [vmem:[#allocation7 + $0x144] ss:$8 sps:$4 sm:$0xff]  }
  0x5d   :  { %313 = vmatprep.subr.bf16.mxu0 %v1484_v17  ;;  %354 = vmatprep.subr.bf16.mxu1 %v1486_v18  ;;  %v1526_v49 = vld [vmem:[#allocation7 + $0x40] ss:$8 sps:$4 sm:$0xff]   ;;  %v1534_v51 = vld [vmem:[#allocation7 + $0x34] ss:$8 sps:$4 sm:$0xff]   ;;  %v1532_v53 = vld [vmem:[#allocation7 + $0x30] ss:$8 sps:$4 sm:$0xff]  }
  0x5e   :  { %v1529_v50 = vld [vmem:[#allocation7 + $0x140] ss:$8 sps:$4 sm:$0xff]   ;;  %v1537_v52 = vld [vmem:[#allocation7 + $0x134] ss:$8 sps:$4 sm:$0xff]   ;;  %v1535_v54 = vld [vmem:[#allocation7 + $0x130] ss:$8 sps:$4 sm:$0xff]  }
  0x5f   :  { %v1540_v55 = vld [vmem:[#allocation7 + $0x24] ss:$8 sps:$4 sm:$0xff]   ;;  %v1538_v57 = vld [vmem:[#allocation7 + $0x20] ss:$8 sps:$4 sm:$0xff]   ;;  %v1546_v59 = vld [vmem:[#allocation7 + $0x14] ss:$8 sps:$4 sm:$0xff]  }
  0x60   :  { %314 = vmatpush1.bf16.msra.mxu0 %v1488_v19  ;;  %355 = vmatpush1.bf16.msra.mxu1 %v1489_v20  ;;  %v1543_v56 = vld [vmem:[#allocation7 + $0x124] ss:$8 sps:$4 sm:$0xff]   ;;  %v1541_v58 = vld [vmem:[#allocation7 + $0x120] ss:$8 sps:$4 sm:$0xff]   ;;  %v1549_v60 = vld [vmem:[#allocation7 + $0x114] ss:$8 sps:$4 sm:$0xff]  }
  0x61   :  { %315 = vmatprep.subr.bf16.mxu0 %v1490_v21  ;;  %356 = vmatprep.subr.bf16.mxu1 %v1492_v22  ;;  %v1544_v61 = vld [vmem:[#allocation7 + $0x10] ss:$8 sps:$4 sm:$0xff]   ;;  %v1552_v63 = vld [vmem:[#allocation7 + $0x4] ss:$8 sps:$4 sm:$0xff]   ;;  %v1550_v2 = vld [vmem:[#allocation7] ss:$8 sps:$4 sm:$0xff]  }
  0x62   :  { %v1547_v62 = vld [vmem:[#allocation7 + $0x110] ss:$8 sps:$4 sm:$0xff]   ;;  %v1555_v1 = vld [vmem:[#allocation7 + $0x104] ss:$8 sps:$4 sm:$0xff]   ;;  %v1553_v3 = vld [vmem:[#allocation7 + $0x100] ss:$8 sps:$4 sm:$0xff]  }
  0x63   :  { %v1558_v4 = vld [vmem:[#allocation7 + $0xf4] ss:$8 sps:$4 sm:$0xff]   ;;  %v1556_v6 = vld [vmem:[#allocation7 + $0xf0] ss:$8 sps:$4 sm:$0xff]   ;;  %v1564_v8 = vld [vmem:[#allocation7 + $0xe4] ss:$8 sps:$4 sm:$0xff]  }
  0x64   :  { %316 = vmatpush1.bf16.msra.mxu0 %v1494_v23  ;;  %357 = vmatpush1.bf16.msra.mxu1 %v1495_v24  ;;  %v1561_v5 = vld [vmem:[#allocation7 + $0x1f4] ss:$8 sps:$4 sm:$0xff]   ;;  %v1559_v7 = vld [vmem:[#allocation7 + $0x1f0] ss:$8 sps:$4 sm:$0xff]   ;;  %v1567_v9 = vld [vmem:[#allocation7 + $0x1e4] ss:$8 sps:$4 sm:$0xff]  }
  0x65   :  { %317 = vmatprep.subr.bf16.mxu0 %v1496_v25  ;;  %358 = vmatprep.subr.bf16.mxu1 %v1498_v26  ;;  %v1562_v10 = vld [vmem:[#allocation7 + $0xe0] ss:$8 sps:$4 sm:$0xff]   ;;  %v1570_v12 = vld [vmem:[#allocation7 + $0xd4] ss:$8 sps:$4 sm:$0xff]   ;;  %v1568_v14 = vld [vmem:[#allocation7 + $0xd0] ss:$8 sps:$4 sm:$0xff]  }
  0x66   :  { %v1565_v11 = vld [vmem:[#allocation7 + $0x1e0] ss:$8 sps:$4 sm:$0xff]   ;;  %v1573_v13 = vld [vmem:[#allocation7 + $0x1d4] ss:$8 sps:$4 sm:$0xff]   ;;  %v1571_v15 = vld [vmem:[#allocation7 + $0x1d0] ss:$8 sps:$4 sm:$0xff]  }
  0x67   :  { %v1576_v16 = vld [vmem:[#allocation7 + $0xc4] ss:$8 sps:$4 sm:$0xff]   ;;  %v1574_v18 = vld [vmem:[#allocation7 + $0xc0] ss:$8 sps:$4 sm:$0xff]   ;;  %v1582_v20 = vld [vmem:[#allocation7 + $0xb4] ss:$8 sps:$4 sm:$0xff]  }
  0x68   :  { %318 = vmatpush1.bf16.msra.mxu0 %v1500_v27  ;;  %359 = vmatpush1.bf16.msra.mxu1 %v1501_v28  ;;  %v1579_v17 = vld [vmem:[#allocation7 + $0x1c4] ss:$8 sps:$4 sm:$0xff]   ;;  %v1577_v19 = vld [vmem:[#allocation7 + $0x1c0] ss:$8 sps:$4 sm:$0xff]   ;;  %v1585_v21 = vld [vmem:[#allocation7 + $0x1b4] ss:$8 sps:$4 sm:$0xff]  }
  0x69   :  { %319 = vmatprep.subr.bf16.mxu0 %v1502_v29  ;;  %360 = vmatprep.subr.bf16.mxu1 %v1504_v30  ;;  %v1580_v22 = vld [vmem:[#allocation7 + $0xb0] ss:$8 sps:$4 sm:$0xff]   ;;  %v1588_v24 = vld [vmem:[#allocation7 + $0xa4] ss:$8 sps:$4 sm:$0xff]   ;;  %v1586_v26 = vld [vmem:[#allocation7 + $0xa0] ss:$8 sps:$4 sm:$0xff]  }
  0x6a   :  { %v1583_v23 = vld [vmem:[#allocation7 + $0x1b0] ss:$8 sps:$4 sm:$0xff]   ;;  %v1591_v25 = vld [vmem:[#allocation7 + $0x1a4] ss:$8 sps:$4 sm:$0xff]   ;;  %v1589_v27 = vld [vmem:[#allocation7 + $0x1a0] ss:$8 sps:$4 sm:$0xff]  }
  0x6b   :  { %v1594_v28 = vld [vmem:[#allocation7 + $0x94] ss:$8 sps:$4 sm:$0xff]   ;;  %v1592_v30 = vld [vmem:[#allocation7 + $0x90] ss:$8 sps:$4 sm:$0xff]   ;;  %v1603_v33 = vld [vmem:[#allocation7 + $0x184] ss:$8 sps:$4 sm:$0xff]  }
  0x6c   :  { %320 = vmatpush1.bf16.msra.mxu0 %v1506_v31  ;;  %361 = vmatpush1.bf16.msra.mxu1 %v1507_v32  ;;  %v1597_v29 = vld [vmem:[#allocation7 + $0x194] ss:$8 sps:$4 sm:$0xff]   ;;  %v1595_v31 = vld [vmem:[#allocation7 + $0x190] ss:$8 sps:$4 sm:$0xff]   ;;  %v1600_v32 = vld [vmem:[#allocation7 + $0x84] ss:$8 sps:$4 sm:$0xff]  }
  0x6d   :  { %837 = vmatprep.subr.bf16.mxu0 %v1510_v34  ;;  %878 = vmatprep.subr.bf16.mxu1 %v1513_v35  ;;  %v1598_v34 = vld [vmem:[#allocation7 + $0x80] ss:$8 sps:$4 sm:$0xff]   ;;  %vm1775_vm0 = vmmov 0  }
  0x6e   :  { %v1601_v35 = vld [vmem:[#allocation7 + $0x180] ss:$8 sps:$4 sm:$0xff]  }
  0x6f   :  { %338 = vmatmul.mubr.bf16.vlgmr.msra.gmra.mxu0 %v112_v36  ;;  %379 = vmatmul.mubr.bf16.vlgmr.msra.gmra.mxu1 %v112_v36  ;;  %v1604_v36 = vld [vmem:[#allocation9 + $0x78] sm:$0xff]  }
  0x70   :  { %838 = vmatpush1.bf16.msra.mxu0 %v1508_v37  ;;  %879 = vmatpush1.bf16.msra.mxu1 %v1511_v38  ;;  %v1773_v37 = vmov 1966171168  }
  0x71   :  { %839 = vmatprep.subr.bf16.mxu0 %v1516_v39  ;;  %880 = vmatprep.subr.bf16.mxu1 %v1519_v40  ;;  %v402_v38 = vunpack.c.l.s4 %v1773_v37  ;;  %v404_v39 = vlaneseq }
  0x73   :  { %v403_v40 = vunpack.c.0.s8 %v402_v38 }
  0x74   :  { %840 = vmatpush1.bf16.msra.mxu0 %v1514_v41  ;;  %881 = vmatpush1.bf16.msra.mxu1 %v1517_v42  ;;  %v405_v41 = vshrl.u32 %v404_v39, 7  ;;  %v1301_v42 = vld.sshfl [vmem:[#allocation6] sm:$0x33 pattern:$0x75316420] }
  0x75   :  { %841 = vmatprep.subr.bf16.mxu0 %v1522_v43  ;;  %882 = vmatprep.subr.bf16.mxu1 %v1525_v44  ;;  %v400_v44 = vcombine.high %v1301_v42, %v1301_v42 }
  0x76   :  { %v1846_v43 = vsub.s32 %v403_v40, %v405_v41 }
  0x78   :  { %842 = vmatpush1.bf16.msra.mxu0 %v1520_v45  ;;  %883 = vmatpush1.bf16.msra.mxu1 %v1523_v46  ;;  %v407_v45 = vrot.slane %v1301_v42, %v1846_v43  ;;  %v414_v46 = vrot.slane %v400_v44, %v1846_v43 }
  0x79   :  { %843 = vmatprep.subr.bf16.mxu0 %v1528_v47  ;;  %884 = vmatprep.subr.bf16.mxu1 %v1531_v48 }
  0x7a   :  { %v415_v47 = vcombine.high %v407_v45, %v407_v45  ;;  %v416_v48 = vcombine.high %v414_v46, %v414_v46 }
  0x7c   :  { %844 = vmatpush1.bf16.msra.mxu0 %v1526_v49  ;;  %885 = vmatpush1.bf16.msra.mxu1 %v1529_v50  ;;  %v418_v49 = vpack.i.b16 %v407_v45, %v407_v45  ;;  %v1850_v50 = vsub.s32 0, %v405_v41 }
  0x7d   :  { %845 = vmatprep.subr.bf16.mxu0 %v1534_v51  ;;  %886 = vmatprep.subr.bf16.mxu1 %v1537_v52  ;;  %v432_v51 = vpack.i.b16 %v415_v47, %v415_v47  ;;  %v425_v52 = vpack.i.b16 %v414_v46, %v414_v46 }
  0x80   :  { %846 = vmatpush1.bf16.msra.mxu0 %v1532_v53  ;;  %887 = vmatpush1.bf16.msra.mxu1 %v1535_v54  ;;  %v439_v53 = vpack.i.b16 %v416_v48, %v416_v48 }
  0x81   :  { %847 = vmatprep.subr.bf16.mxu0 %v1540_v55  ;;  %888 = vmatprep.subr.bf16.mxu1 %v1543_v56  ;;  %v423_v55 = vrot.slane %v418_v49, %v1850_v50 }
  0x84   :  { %848 = vmatpush1.bf16.msra.mxu0 %v1538_v57  ;;  %889 = vmatpush1.bf16.msra.mxu1 %v1541_v58  ;;  %v437_v57 = vrot.slane %v432_v51, %v1850_v50 }
  0x85   :  { %849 = vmatprep.subr.bf16.mxu0 %v1546_v59  ;;  %890 = vmatprep.subr.bf16.mxu1 %v1549_v60  ;;  %v430_v60 = vrot.slane %v425_v52, %v1850_v50 }
  0x88   :  { %850 = vmatpush1.bf16.msra.mxu0 %v1544_v61  ;;  %891 = vmatpush1.bf16.msra.mxu1 %v1547_v62  ;;  %v444_v61 = vrot.slane %v439_v53, %v1850_v50 }
  0x89   :  { %851 = vmatprep.subr.bf16.mxu0 %v1552_v63  ;;  %892 = vmatprep.subr.bf16.mxu1 %v1555_v1 }
  0x8c   :  { %852 = vmatpush1.bf16.msra.mxu0 %v1550_v2  ;;  %893 = vmatpush1.bf16.msra.mxu1 %v1553_v3 }
  0x8d   :  { %853 = vmatprep.subr.bf16.mxu0 %v1558_v4  ;;  %894 = vmatprep.subr.bf16.mxu1 %v1561_v5 }
  0x90   :  { %854 = vmatpush2.bf16.msra.mxu0 %v1556_v6  ;;  %895 = vmatpush2.bf16.msra.mxu1 %v1559_v7 }
  0x91   :  { %855 = vmatprep.subr.bf16.mxu0 %v1564_v8  ;;  %896 = vmatprep.subr.bf16.mxu1 %v1567_v9 }
  0x94   :  { %856 = vmatpush2.bf16.msra.mxu0 %v1562_v10  ;;  %897 = vmatpush2.bf16.msra.mxu1 %v1565_v11 }
  0x95   :  { %857 = vmatprep.subr.bf16.mxu0 %v1570_v12  ;;  %898 = vmatprep.subr.bf16.mxu1 %v1573_v13  ;;  %v1605_v13 = vld [vmem:[#allocation9 + $0x38] sm:$0xff]  }
  0x98   :  { %858 = vmatpush2.bf16.msra.mxu0 %v1568_v14  ;;  %899 = vmatpush2.bf16.msra.mxu1 %v1571_v15 }
  0x99   :  { %859 = vmatprep.subr.bf16.mxu0 %v1576_v16  ;;  %900 = vmatprep.subr.bf16.mxu1 %v1579_v17  ;;  %v1606_v16 = vld [vmem:[#allocation9 + $0x70] sm:$0xff]  }
  0x9a   :  { %v1607_v17 = vld [vmem:[#allocation9 + $0x30] sm:$0xff]  }
  0x9c   :  { %860 = vmatpush2.bf16.msra.mxu0 %v1574_v18  ;;  %901 = vmatpush2.bf16.msra.mxu1 %v1577_v19  ;;  %v1608_v18 = vld [vmem:[#allocation9 + $0x68] sm:$0xff]  }
  0x9d   :  { %861 = vmatprep.subr.bf16.mxu0 %v1582_v20  ;;  %902 = vmatprep.subr.bf16.mxu1 %v1585_v21  ;;  %v1609_v19 = vld [vmem:[#allocation9 + $0x28] sm:$0xff]   ;;  %v1610_v20 = vld [vmem:[#allocation9 + $0x60] sm:$0xff]  }
  0x9e   :  { %v1611_v21 = vld [vmem:[#allocation9 + $0x20] sm:$0xff]  }
  0xa0   :  { %862 = vmatpush2.bf16.msra.mxu0 %v1580_v22  ;;  %903 = vmatpush2.bf16.msra.mxu1 %v1583_v23  ;;  %v1612_v22 = vld [vmem:[#allocation9 + $0x58] sm:$0xff]  }
  0xa1   :  { %863 = vmatprep.subr.bf16.mxu0 %v1588_v24  ;;  %904 = vmatprep.subr.bf16.mxu1 %v1591_v25  ;;  %v1613_v23 = vld [vmem:[#allocation9 + $0x18] sm:$0xff]   ;;  %v1614_v24 = vld [vmem:[#allocation9 + $0x50] sm:$0xff]  }
  0xa2   :  { %v1615_v25 = vld [vmem:[#allocation9 + $0x10] sm:$0xff]  }
  0xa4   :  { %864 = vmatpush2.bf16.msra.mxu0 %v1586_v26  ;;  %905 = vmatpush2.bf16.msra.mxu1 %v1589_v27  ;;  %v1616_v26 = vld [vmem:[#allocation9 + $0x48] sm:$0xff]  }
  0xa5   :  { %865 = vmatprep.subr.bf16.mxu0 %v1594_v28  ;;  %906 = vmatprep.subr.bf16.mxu1 %v1597_v29  ;;  %v1617_v27 = vld [vmem:[#allocation9 + $0x8] sm:$0xff]   ;;  %v1618_v28 = vld [vmem:[#allocation9 + $0x40] sm:$0xff]  }
  0xa6   :  { %v1619_v29 = vld [vmem:[#allocation9] sm:$0xff]  }
  0xa8   :  { %866 = vmatpush2.bf16.msra.mxu0 %v1592_v30  ;;  %907 = vmatpush2.bf16.msra.mxu1 %v1595_v31  ;;  %v1620_v30 = vld [vmem:[#allocation10 + $0x38] sm:$0xff]   ;;  %v1774_v31 = vmov 0.0  }
  0xa9   :  { %867 = vmatprep.subr.bf16.mxu0 %v1600_v32  ;;  %908 = vmatprep.subr.bf16.mxu1 %v1603_v33  ;;  %v1621_v32 = vld [vmem:[#allocation10 + $0x30] sm:$0xff]   ;;  %v1622_v33 = vld [vmem:[#allocation10 + $0x28] sm:$0xff]  }
  0xac   :  { %868 = vmatpush2.bf16.msra.mxu0 %v1598_v34  ;;  %909 = vmatpush2.bf16.msra.mxu1 %v1601_v35  ;;  %v1623_v34 = vld [vmem:[#allocation10 + $0x20] sm:$0xff]   ;;  %v1624_v35 = vld [vmem:[#allocation10 + $0x18] sm:$0xff]  }
  0xad   :  { %1393 = vmatprep.subr.bf16.mxu0 %v1604_v36  ;;  %1424 = vmatprep.subr.bf16.mxu1 %v1774_v31  ;;  %v1366_v36 = vld.sshfl [vmem:[%s1884_s4] sm:$0x11 pattern:$0x75316420] }
  0xae   :  { %v930_v37 = vcombine.high %v1366_v36, %v1366_v36  ;;  %v937_v38 = vrot.slane %v1366_v36, %v1846_v43 }
  0xb0   :  { %v944_v39 = vrot.slane %v930_v37, %v1846_v43  ;;  %v946_v40 = vpack.i.b16 %v937_v38, %v937_v38 }
  0xb2   :  { %v953_v41 = vpack.i.b16 %v944_v39, %v944_v39  ;;  %v951_v46 = vrot.slane %v946_v40, %v1850_v50 }
  0xb4   :  { %v958_v52 = vrot.slane %v953_v41, %v1850_v50 }
 0x12f   :  { %v339_v54 = vpop.f32.mrf.mxu0  ;;  %v380_v56 = vpop.f32.mrf.mxu1 }
 0x130   :  { %v388_v58 = vpack.c.bf16 %v339_v54, %v339_v54  ;;  %v390_v59 = vpack.c.bf16 %v380_v56, %v380_v56 }
 0x131   :  { %v341_v62 = vpop.f32.mrf.mxu0  ;;  %v382_v63 = vpop.f32.mrf.mxu1 }
 0x132   :  { %v389_v1 = vpack.c.bf16 %v341_v62, %v341_v62  ;;  %v391_v2 = vpack.c.bf16 %v382_v63, %v382_v63  ;;  %v445_v3 = vadd.bf16 %v423_v55, %v388_v58  ;;  %v447_v4 = vadd.bf16 %v437_v57, %v390_v59  ;;  %v1626_v62 = vld [vmem:[#allocation10 + $0x8] sm:$0xff]   ;;  %v1627_v63 = vld [vmem:[#allocation10] sm:$0xff]  }
 0x133   :  { %v343_v5 = vpop.f32.mrf.mxu0  ;;  %v384_v6 = vpop.f32.mrf.mxu1 }
 0x134   :  { %v446_v7 = vadd.bf16 %v430_v60, %v389_v1  ;;  %v448_v8 = vadd.bf16 %v444_v61, %v391_v2  ;;  %v449_v14 = vmax.bf16 %v1772_v0, %v445_v3  ;;  %v451_v15 = vmax.bf16 %v1772_v0, %v447_v4  ;;  %v1625_v61 = vld [vmem:[#allocation10 + $0x10] sm:$0xff]  }
 0x135   :  { %v344_v9 = vpop.f32.mrf.mxu0  ;;  %v385_v10 = vpop.f32.mrf.mxu1  ;;  %v1131_v1 = vld [vmem:[%s1886_s6] sm:$0x1] }
 0x136   :  { %v450_v11 = vmax.bf16 %v1772_v0, %v446_v7  ;;  %v452_v12 = vmax.bf16 %v1772_v0, %v448_v8  ;;  %v1134_v2 = vpack.i.b16 %v1131_v1, %v1131_v1 }
 0x138   :  { %869 = vmatprep.mubr.bf16.mxu0 %v450_v11  ;;  %910 = vmatprep.mubr.bf16.mxu1 %v452_v12  ;;  %v1139_v6 = vrot.slane %v1134_v2, %v1850_v50  ;;  %v1383_v12 = vld [vmem:[%s1888_s8] ss:$0 sm:$0xff] }
 0x139   :  { %870 = vmatmul.mubr.bf16.vlgmr.msra.gmra.mxu0 %v449_v14  ;;  %911 = vmatmul.mubr.bf16.vlgmr.msra.gmra.mxu1 %v451_v15 }
 0x13a   :  { %1394 = vmatpush3.bf16.msra.mxu0 %v1605_v13  ;;  %1425 = vmatpush3.bf16.msra.mxu1 %v1620_v30 }
 0x13b   :  { %1395 = vmatprep.subr.bf16.mxu0 %v1606_v16  ;;  %1426 = vmatprep.subr.bf16.mxu1 %v1774_v31 }
 0x13c   :  { %1440 = vmatprep.mubr.msk.bf16.mxu1 %vm1775_vm0, %v1774_v31 }
 0x13e   :  { %1396 = vmatpush3.bf16.msra.mxu0 %v1607_v17  ;;  %1427 = vmatpush3.bf16.msra.mxu1 %v1621_v32 }
 0x13f   :  { %1397 = vmatprep.subr.bf16.mxu0 %v1608_v18  ;;  %1428 = vmatprep.subr.bf16.mxu1 %v1774_v31 }
 0x142   :  { %1398 = vmatpush3.bf16.msra.mxu0 %v1609_v19  ;;  %1429 = vmatpush3.bf16.msra.mxu1 %v1622_v33 }
 0x143   :  { %1399 = vmatprep.subr.bf16.mxu0 %v1610_v20  ;;  %1430 = vmatprep.subr.bf16.mxu1 %v1774_v31 }
 0x146   :  { %1400 = vmatpush3.bf16.msra.mxu0 %v1611_v21  ;;  %1431 = vmatpush3.bf16.msra.mxu1 %v1623_v34 }
 0x147   :  { %1401 = vmatprep.subr.bf16.mxu0 %v1612_v22  ;;  %1432 = vmatprep.subr.bf16.mxu1 %v1774_v31 }
 0x14a   :  { %1402 = vmatpush3.bf16.msra.mxu0 %v1613_v23  ;;  %1433 = vmatpush3.bf16.msra.mxu1 %v1624_v35 }
 0x14b   :  { %1403 = vmatprep.subr.bf16.mxu0 %v1614_v24  ;;  %1434 = vmatprep.subr.bf16.mxu1 %v1774_v31 }
 0x14e   :  { %1404 = vmatpush3.bf16.msra.mxu0 %v1615_v25  ;;  %1435 = vmatpush3.bf16.msra.mxu1 %v1625_v61 }
 0x14f   :  { %1405 = vmatprep.subr.bf16.mxu0 %v1616_v26  ;;  %1436 = vmatprep.subr.bf16.mxu1 %v1774_v31 }
 0x152   :  { %1406 = vmatpush3.bf16.msra.mxu0 %v1617_v27  ;;  %1437 = vmatpush3.bf16.msra.mxu1 %v1626_v62 }
 0x153   :  { %1407 = vmatprep.subr.bf16.mxu0 %v1618_v28  ;;  %1438 = vmatprep.subr.bf16.mxu1 %v1774_v31 }
 0x156   :  { %1408 = vmatpush3.bf16.msra.mxu0 %v1619_v29  ;;  %1439 = vmatpush3.bf16.msra.mxu1 %v1627_v63 }
 0x1f9   :  { %v871_v42 = vpop.f32.mrf.mxu0  ;;  %v912_v44 = vpop.f32.mrf.mxu1 }
 0x1fa   :  { %v913_v45 = vadd.f32 %v912_v44, %v871_v42 }
 0x1fb   :  { %v873_v47 = vpop.f32.mrf.mxu0  ;;  %v914_v48 = vpop.f32.mrf.mxu1 }
 0x1fc   :  { %v920_v49 = vpack.c.bf16 %v913_v45, %v913_v45  ;;  %v915_v51 = vadd.f32 %v914_v48, %v873_v47 }
 0x1fd   :  { %v875_v53 = vpop.f32.mrf.mxu0  ;;  %v916_v54 = vpop.f32.mrf.mxu1 }
 0x1fe   :  { %v921_v55 = vpack.c.bf16 %v915_v51, %v915_v51  ;;  %v959_v56 = vadd.bf16 %v951_v46, %v920_v49 }
 0x1ff   :  { %v876_v57 = vpop.f32.mrf.mxu0  ;;  %v917_v58 = vpop.f32.mrf.mxu1 }
 0x200   :  { %v960_v43 = vadd.bf16 %v958_v52, %v921_v55  ;;  %v961_v60 = vmax.bf16 %v1772_v0, %v959_v56 }
 0x202   :  { %v962_v59 = vmax.bf16 %v1772_v0, %v960_v43 }
 0x204   :  { %1123 = vmatprep.mubr.bf16.mxu0 %v962_v59 }
 0x205   :  { %1124 = vmatmul.mubr.bf16.vlgmr.msra.gmra.mxu0 %v961_v60 }
 0x2c5   :  { %v1409_v3 = vpop.f32.mrf.mxu0 }
 0x2c7   :  { %v1410_v4 = vpop.f32.mrf.mxu0 }
 0x2c8   :  { %v1411_v5 = vadd.f32 %v1410_v4, %v1409_v3 }
 0x2c9   :  { %v1412_v7 = vpop.f32.mrf.mxu0 }
 0x2ca   :  { %v1132_v8 = vpack.c.bf16 %v1411_v5, %v1411_v5 }
 0x2cb   :  { %v1413_v9 = vpop.f32.mrf.mxu0 }
 0x2cc   :  { %v1140_v10 = vadd.bf16 %v1139_v6, %v1132_v8 }
 0x2ce   :  { %v1141_v11 = vmax.bf16 %v1772_v0, %v1140_v10 }
 0x2d0   :  { %1441 = vmatmul.mubr.bf16.vlgmr.msra.gmra.mxu1 %v1141_v11 }
 0x390   :  { %v1247_v13 = vpop.f32.mrf.mxu1 }
 0x391   :  { %v1248_v14 = vadd.f32 %v1383_v12, %v1247_v13 }
 0x392   :  { %v1442_v15 = vpop.f32.mrf.mxu1 }
 0x393   :  { %v1392_v16 = vmul.f32 -1.442695, %v1248_v14 }
 0x394   :  { %v1250_v17 = vpop.f32.mrf.mxu1 }
 0x395   :  { %1628 = vpow2.f32 %v1392_v16 }
 0x396   :  { %v1443_v18 = vpop.f32.mrf.mxu1 }
 0x3a2   :  { %v1629_v19 = vpop.eup %1628 }
 0x3a3   :  { %v1256_v50 = vadd.f32 1.0, %v1629_v19 }
 0x3a5   :  { %1630 = vrcp.f32 %v1256_v50 }
 0x3b2   :  { %v1631_v20 = vpop.eup %1630 }
 0x3b3   :  { %v1259_v21 = vpack.c.bf16 %v1631_v20, %v1631_v20 }
 0x3b5   :  { %1260 = vst [vmem:[%s1889_s9] sm:$0xf] %v1259_v21 }
 0x3b6   :  { %1265 = vsyncpa [#allocation3], 1 }
 0x3b7   :  { %1266 = vsyncpa [#allocation5], 1 }
 0x3b8   :  { %1267 = vsyncpa [#allocation8], 1 }
 0x3b9   :  { %1268 = vsyncpa [#allocation11], 1 }

</bundles_post_ra>
